<compile_context>
chip_gen: v6e
topology: v6e:2x2x1
jax: 0.10.0
libtpu: 0.0.40
codegen_flags: <defaults>
</compile_context>

<pallas_src>
import jax
import jax.numpy as jnp
from jax.experimental import pallas as pl
from jax.experimental.pallas import tpu as pltpu


def _round_up(x: int, m: int) -> int:
    return ((x + m - 1) // m) * m


def patch_embed_kernel(x_ref, w_ref, b_ref, o_ref):
    # x_ref: [tm, K], w_ref: [K, Ep] (resident), b_ref: [1, Ep] (resident),
    # o_ref: [tm, Ep].  f32 accumulate on the MXU, bias add, cast to out dtype.
    acc = jnp.dot(x_ref[...], w_ref[...], preferred_element_type=jnp.float32)
    o_ref[...] = (acc + b_ref[...].astype(jnp.float32)).astype(o_ref.dtype)


def patch_embedding(x, weight, bias, patch_size, *, block_m=256, compute_dtype=None):
    """x: [B, C, H, W] (NCHW), weight: [E, C, p, p], bias: [E] -> [B, N, E]."""
    B, C, H, W = x.shape
    p = patch_size
    E = weight.shape[0]
    assert H % p == 0 and W % p == 0, "img_size must be divisible by patch_size"
    nH, nW = H // p, W // p
    N = nH * nW
    K = C * p * p
    M = B * N

    # TODO(synk): fuse the patch-extraction rearrangement into the kernel
    # (BlockSpec over raw NCHW slabs) to drop one HBM round-trip of the patch
    # matrix; the required in-kernel 5-D transpose on sub-(8,128) tiles (p=4)
    # does not lower reliably in Mosaic, so it stays in the wrapper.
    patches = (
        x.reshape(B, C, nH, p, nW, p)
        .transpose(0, 2, 4, 1, 3, 5)          # [B, nH, nW, C, p, p]
        .reshape(M, K)                        # inner order (c, kh, kw) == conv weight
    )
    w2 = weight.reshape(E, K).T               # [K, E]
    b2 = bias.reshape(1, E)

    if compute_dtype is not None:
        patches = patches.astype(compute_dtype)
        w2 = w2.astype(compute_dtype)

    # Lane-dense output: pad E up to a multiple of 128 (unmasked stores).
    Ep = _round_up(E, 128)
    if Ep != E:
        w2 = jnp.pad(w2, ((0, 0), (0, Ep - E)))
        b2 = jnp.pad(b2, ((0, 0), (0, Ep - E)))

    # Tile M; pad M so the tile divides it exactly (tile multiple of 8 sublanes).
    tm = _round_up(min(block_m, _round_up(M, 8)), 8)
    Mp = _round_up(M, tm)
    if Mp != M:
        patches = jnp.pad(patches, ((0, Mp - M), (0, 0)))
    grid_m = Mp // tm

    # Explicit VMEM budget: 2x double-buffered (tm,K) input + (tm,Ep) output
    # + resident weight/bias, with headroom; floor 32 MiB, cap 64 MiB (v7x).
    in_item = jnp.dtype(patches.dtype).itemsize
    out_item = jnp.dtype(x.dtype).itemsize
    vmem_bytes = (2 * tm * K * in_item
                  + 2 * tm * Ep * out_item
                  + K * Ep * in_item
                  + Ep * 4)
    vmem_limit = int(min(max(2 * vmem_bytes, 32 * 2**20), 64 * 2**20))

    out = pl.pallas_call(
        patch_embed_kernel,
        out_shape=jax.ShapeDtypeStruct((Mp, Ep), x.dtype),
        grid=(grid_m,),
        in_specs=[
            pl.BlockSpec((tm, K), lambda i: (i, 0)),   # streamed patch-row tiles
            pl.BlockSpec((K, Ep), lambda i: (0, 0)),   # weight: loaded once, resident
            pl.BlockSpec((1, Ep), lambda i: (0, 0)),   # bias:   loaded once, resident
        ],
        out_specs=pl.BlockSpec((tm, Ep), lambda i: (i, 0)),
        compiler_params=pltpu.CompilerParams(
            dimension_semantics=("parallel",),          # shard M over v7x's 2 TCs
            vmem_limit_bytes=vmem_limit,
        ),
    )(patches, w2, b2)

    return out[:M, :E].reshape(B, N, E)


def _reference(x, weight, bias, patch_size):
    # Pure-JAX reference: strided conv == patch-extract + matmul.
    B, C, H, W = x.shape
    p = patch_size
    E = weight.shape[0]
    nH, nW = H // p, W // p
    patches = (
        x.reshape(B, C, nH, p, nW, p)
        .transpose(0, 2, 4, 1, 3, 5)
        .reshape(B, nH * nW, C * p * p)
    )
    return jnp.einsum("bnk,ek->bne", patches, weight.reshape(E, -1)) + bias[None, None, :]


if __name__ == "__main__":
    # Module defaults: img_size=(28, 28), patch_size=4, in_channels=1, embed_dim=192
    B, C, H, W = 2, 1, 28, 28
    patch_size = 4
    embed_dim = 192

    key = jax.random.PRNGKey(0)
    kx, kw, kb = jax.random.split(key, 3)
    x = jax.random.normal(kx, (B, C, H, W), dtype=jnp.float32)
    # Deterministic synthetic params (shapes per nn.Conv2d(C, E, p, stride=p)).
    weight = jax.random.normal(kw, (embed_dim, C, patch_size, patch_size),
                               dtype=jnp.float32) * 0.02
    bias = jax.random.normal(kb, (embed_dim,), dtype=jnp.float32) * 0.02

    n_patches = (H // patch_size) * (W // patch_size)
    ref = _reference(x, weight, bias, patch_size)

    # 1) Default tiling (single tile at this tiny demo size), f32.
    out = jax.block_until_ready(patch_embedding(x, weight, bias, patch_size))
    assert out.shape == (B, n_patches, embed_dim), out.shape
    assert jnp.allclose(out, ref, atol=1e-4, rtol=1e-4)

    # 2) Small tile to exercise the multi-block grid + M/E padding path.
    out_tiled = jax.block_until_ready(
        patch_embedding(x, weight, bias, patch_size, block_m=64))
    assert out_tiled.shape == (B, n_patches, embed_dim), out_tiled.shape
    assert jnp.allclose(out_tiled, ref, atol=1e-4, rtol=1e-4)

    # 3) bf16 compute path (halved HBM traffic / native MXU path), f32 accumulate.
    out_bf16 = jax.block_until_ready(
        patch_embedding(x, weight, bias, patch_size, block_m=64,
                        compute_dtype=jnp.bfloat16))
    assert out_bf16.shape == (B, n_patches, embed_dim), out_bf16.shape
    assert float(jnp.max(jnp.abs(out_bf16 - ref))) < 5e-2

    print("KERNEL_OK")
</pallas_src>

<mosaic_0001>
module attributes {stable_mosaic.version = 11 : i64} {
  func.func @patch_embed_kernel(%arg0: i32, %arg1: memref<104x16xf32, #tpu.memory_space<vmem>>, %arg2: memref<16x256xf32, #tpu.memory_space<vmem>>, %arg3: memref<1x256xf32, #tpu.memory_space<vmem>>, %arg4: memref<104x256xf32, #tpu.memory_space<vmem>>) attributes {dimension_semantics = [#tpu.dimension_semantics<parallel>], iteration_bounds = array<i64: 1>, scalar_prefetch = 0 : i64, scratch_operands = 0 : i64, tpu.core_type = #tpu.core_type<tc>, window_params = [{transform_indices = @transform_0, window_bounds = array<i64: 104, 16>}, {pipeline_mode = #tpu.pipeline_mode<synchronous>, transform_indices = @transform_1, window_bounds = array<i64: 16, 256>}, {pipeline_mode = #tpu.pipeline_mode<synchronous>, transform_indices = @transform_2, window_bounds = array<i64: 1, 256>}, {transform_indices = @transform_3, window_bounds = array<i64: 104, 256>}]} {
    %c0 = arith.constant 0 : index
    %c0_0 = arith.constant 0 : index
    %0 = vector.load %arg1[%c0, %c0_0] : memref<104x16xf32, #tpu.memory_space<vmem>>, vector<104x16xf32>
    %c0_1 = arith.constant 0 : index
    %c0_2 = arith.constant 0 : index
    %1 = vector.load %arg2[%c0_1, %c0_2] : memref<16x256xf32, #tpu.memory_space<vmem>>, vector<16x256xf32>
    %cst = arith.constant dense<0.000000e+00> : vector<104x256xf32>
    %2 = tpu.matmul %0, %1, %cst {dimension_numbers = #tpu.dot_dimension_numbers<[1], [0], [0], [1], [0, 0, 1, 1], [], []>} : vector<104x16xf32>, vector<16x256xf32>, vector<104x256xf32> -> vector<104x256xf32>
    %c0_3 = arith.constant 0 : index
    %c0_4 = arith.constant 0 : index
    %3 = vector.load %arg3[%c0_3, %c0_4] : memref<1x256xf32, #tpu.memory_space<vmem>>, vector<1x256xf32>
    %4 = vector.broadcast %3 : vector<1x256xf32> to vector<104x256xf32>
    %5 = arith.addf %2, %4 : vector<104x256xf32>
    %c0_5 = arith.constant 0 : index
    %c0_6 = arith.constant 0 : index
    %6 = vector.load %arg4[%c0_5, %c0_6] : memref<104x256xf32, #tpu.memory_space<vmem>>, vector<104x256xf32>
    tpu.vector_store %arg4[%c0_5, %c0_6], %5 {strides = array<i32>} : memref<104x256xf32, #tpu.memory_space<vmem>>, vector<104x256xf32>,
    return
  }
  func.func @transform_0(%arg0: i32) -> (i32, i32) {
    %c0_i32 = arith.constant 0 : i32
    %c0_i32_0 = arith.constant 0 : i32
    return %arg0, %c0_i32 : i32, i32
  }
  func.func @transform_1(%arg0: i32) -> (i32, i32) {
    %c0_i32 = arith.constant 0 : i32
    %c0_i32_0 = arith.constant 0 : i32
    %c0_i32_1 = arith.constant 0 : i32
    return %c0_i32, %c0_i32_0 : i32, i32
  }
  func.func @transform_2(%arg0: i32) -> (i32, i32) {
    %c0_i32 = arith.constant 0 : i32
    %c0_i32_0 = arith.constant 0 : i32
    %c0_i32_1 = arith.constant 0 : i32
    return %c0_i32, %c0_i32_0 : i32, i32
  }
  func.func @transform_3(%arg0: i32) -> (i32, i32) {
    %c0_i32 = arith.constant 0 : i32
    %c0_i32_0 = arith.constant 0 : i32
    return %arg0, %c0_i32 : i32, i32
  }
}

</mosaic_0001>

<bundles_post_ra>
// kernel: tpu_custom_call.1
= control target key start
LH: loop header
LB: loop body
LE: loop exit
PB: predicated region body
PF: predicated region fallthrough
CT: control target
= control target key end

     0   :  { %vm44_vm0 = vcmask 130048   ;;  %v312_v5 = vmov 0.0   ;;  %s436_s0 = inlined_call_operand.vmem [shape: f32[104,16], index: 0, kind: input, shape index: {}]   ;;  %s437_s1 = inlined_call_operand.vmem [shape: f32[16,256], index: 1, kind: input, shape index: {}]   ;;  %s438_s2 = inlined_call_operand.vmem [shape: f32[1,256], index: 2, kind: input, shape index: {}]   ;;  %s439_s3 = inlined_call_operand.hbm [shape: f32[104,256], index: 3, kind: output, shape index: {}]  }
   0x1   :  { %v31_v0 = vld [vmem:[%s437_s1 + $0x18] sm:$0xff]  ;;  %v30_v1 = vld [vmem:[%s437_s1 + $0x10] sm:$0xff]  ;;  %v29_v2 = vld [vmem:[%s437_s1 + $0x8] sm:$0xff]  ;;  %148 = vmatprep.mubr.f32.mxu0 %v312_v5  ;;  %190 = vmatprep.mubr.f32.mxu1 %v312_v5 }
   0x2   :  { %112 = vmatprep.subr.mxu0 %v31_v0  ;;  %282 = vmatprep.subr.mxu1 %v31_v0  ;;  %v28_v3 = vld [vmem:[%s437_s1] sm:$0xff]  ;;  %v22_v6 = vld [vmem:[%s436_s0 + $0x38] sm:$0xff]  ;;  %v16_v7 = vld [vmem:[%s436_s0 + $0x8] sm:$0xff] }
   0x3   :  { %113 = vmatpush1.msra.mxu0 %v30_v1  ;;  %284 = vmatpush1.msra.mxu1 %v30_v1  ;;  %v15_v4 = vld [vmem:[%s436_s0] sm:$0xff] }
   0x4   :  { %114 = vmatprep.subr.mxu0 %v29_v2  ;;  %283 = vmatprep.subr.mxu1 %v29_v2 }
   0x5   :  { %115 = vmatpush1.msra.mxu0 %v28_v3  ;;  %285 = vmatpush1.msra.mxu1 %v28_v3 }
   0x6   :  { %269 = vmatmul.mubr.msk.f32.vlgmr.msra.gmra.mxu0 %vm44_vm0, %v15_v4 }
   0x7   :  { %154 = vmatprep.mubr.f32.mxu0 %v312_v5 }
   0x8   :  { %8 = vsyncpa [#allocation3], 0  ;;  %276 = vmatmul.mubr.msk.f32.vlgmr.msra.gmra.mxu1 %vm44_vm0, %v22_v6  ;;  %v23_v8 = vld [vmem:[%s436_s0 + $0x40] sm:$0xff]  ;;  %v17_v9 = vld [vmem:[%s436_s0 + $0x10] sm:$0xff]  ;;  %v34_v18 = vlaneseq }
   0x9   :  { %196 = vmatprep.mubr.f32.mxu1 %v312_v5  ;;  %v24_v10 = vld [vmem:[%s436_s0 + $0x48] sm:$0xff]  ;;  %v18_v11 = vld [vmem:[%s436_s0 + $0x18] sm:$0xff]  ;;  %v25_v12 = vld [vmem:[%s436_s0 + $0x50] sm:$0xff] }
   0xa   :  { %270 = vmatmul.mubr.msk.f32.gmra.mxu0 %vm44_vm0, %v16_v7  ;;  %v19_v13 = vld [vmem:[%s436_s0 + $0x20] sm:$0xff]  ;;  %v26_v14 = vld [vmem:[%s436_s0 + $0x58] sm:$0xff]  ;;  %v20_v15 = vld [vmem:[%s436_s0 + $0x28] sm:$0xff]  ;;  %v35_v19 = vshrl.u32 %v34_v18, 7 }
   0xb   :  { %160 = vmatprep.mubr.f32.mxu0 %v312_v5  ;;  %v27_v16 = vld [vmem:[%s436_s0 + $0x60] sm:$0xff]  ;;  %v21_v17 = vld [vmem:[%s436_s0 + $0x30] sm:$0xff]  ;;  %s313_s0 = smov [#allocation2]  }
   0xc   :  { %277 = vmatmul.mubr.msk.f32.gmra.mxu1 %vm44_vm0, %v23_v8  ;;  %v36_v20 = vsub.s32 0, %v35_v19  ;;  %v32_v21 = vld [vmem:[%s438_s2] sm:$0x3]  ;;  %v40_v22 = vsub.s32 1, %v35_v19  ;;  %s258_s2 = sshll.u32 %s313_s0, 4  ;;  %s259_s2 = int_to_ptr.vmem [resolvable:$true] %s258_s2 }
   0xd   :  { %202 = vmatprep.mubr.f32.mxu1 %v312_v5  ;;  %s290_s20 = scalar_lea.vmem %s259_s2, 3328  ;;  %p295_p1 = scmp.lt.s32.totalorder %s259_s2, %s259_s2 }
   0xe   :  { %271 = vmatmul.mubr.msk.f32.gmra.mxu0 %vm44_vm0, %v17_v9  ;;  %v403_v23 = vrot.slane %v32_v21, %v36_v20  ;;  %v405_v24 = vrot.slane %v32_v21, %v40_v22  ;;  %p291_p0 = scmp.ne.s32.totalorder %s259_s2, %s290_s20  ;;  %p296_p2 = scmp.lt.s32.totalorder %s290_s20, %s290_s20 }
   0xf   :  { %166 = vmatprep.mubr.f32.mxu0 %v312_v5 }
  0x10   :  { %278 = vmatmul.mubr.msk.f32.gmra.mxu1 %vm44_vm0, %v24_v10  ;;  %p297_p3 = por %p296_p2, %p295_p1 }
  0x11   :  { %208 = vmatprep.mubr.f32.mxu1 %v312_v5 }
  0x12   :  { %272 = vmatmul.mubr.msk.f32.gmra.mxu0 %vm44_vm0, %v18_v11  ;;  %p298_p4 = pnand %p297_p3, %p291_p0 }
  0x13   :  { %172 = vmatprep.mubr.f32.mxu0 %v312_v5 }
  0x14   :  { %279 = vmatmul.mubr.msk.f32.gmra.mxu1 %vm44_vm0, %v25_v12 }
  0x15   :  { %214 = vmatprep.mubr.f32.mxu1 %v312_v5 }
  0x16   :  { %273 = vmatmul.mubr.msk.f32.gmra.mxu0 %vm44_vm0, %v19_v13 }
  0x17   :  { %178 = vmatprep.mubr.f32.mxu0 %v312_v5 }
  0x18   :  { %280 = vmatmul.mubr.msk.f32.gmra.mxu1 %vm44_vm0, %v26_v14 }
  0x19   :  { %220 = vmatprep.mubr.f32.mxu1 %v312_v5 }
  0x1a   :  { %274 = vmatmul.mubr.msk.f32.gmra.mxu0 %vm44_vm0, %v20_v15 }
  0x1b   :  { %184 = vmatprep.mubr.f32.mxu0 %v312_v5 }
  0x1c   :  { %281 = vmatmul.mubr.msk.f32.gmra.mxu1 %vm44_vm0, %v27_v16 }
  0x1e   :  { %275 = vmatmul.mubr.msk.f32.gmra.mxu0 %vm44_vm0, %v21_v17 }
  0xc6   :  { %v150_v25 = vpop.f32.mrf.mxu0 }
  0xc7   :  { %v151_v26 = vadd.f32 %v150_v25, %v403_v23 }
  0xc8   :  { %v152_v27 = vpop.f32.mrf.mxu0  ;;  %v192_v28 = vpop.f32.mrf.mxu1 }
  0xc9   :  { %227 = vst [vmem:[#allocation2] sm:$0xff] %v151_v26  ;;  %v153_v29 = vadd.f32 %v152_v27, %v405_v24  ;;  %v193_v30 = vadd.f32 %v192_v28, %v403_v23 }
  0xca   :  { %v156_v31 = vpop.f32.mrf.mxu0  ;;  %v194_v32 = vpop.f32.mrf.mxu1 }
  0xcb   :  { %228 = vst [vmem:[#allocation2 + $0x8] sm:$0xff] %v153_v29  ;;  %241 = vst [vmem:[#allocation2 + $0x70] sm:$0xff] %v193_v30  ;;  %v157_v33 = vadd.f32 %v156_v31, %v403_v23  ;;  %v195_v34 = vadd.f32 %v194_v32, %v405_v24 }
  0xcc   :  { %v158_v35 = vpop.f32.mrf.mxu0  ;;  %v198_v36 = vpop.f32.mrf.mxu1 }
  0xcd   :  { %229 = vst [vmem:[#allocation2 + $0x10] sm:$0xff] %v157_v33  ;;  %242 = vst [vmem:[#allocation2 + $0x78] sm:$0xff] %v195_v34  ;;  %v159_v37 = vadd.f32 %v158_v35, %v405_v24  ;;  %v199_v38 = vadd.f32 %v198_v36, %v403_v23 }
  0xce   :  { %v162_v39 = vpop.f32.mrf.mxu0  ;;  %v200_v40 = vpop.f32.mrf.mxu1 }
  0xcf   :  { %230 = vst [vmem:[#allocation2 + $0x18] sm:$0xff] %v159_v37  ;;  %243 = vst [vmem:[#allocation2 + $0x80] sm:$0xff] %v199_v38  ;;  %v163_v41 = vadd.f32 %v162_v39, %v403_v23  ;;  %v201_v42 = vadd.f32 %v200_v40, %v405_v24 }
  0xd0   :  { %v164_v43 = vpop.f32.mrf.mxu0  ;;  %v204_v44 = vpop.f32.mrf.mxu1 }
  0xd1   :  { %231 = vst [vmem:[#allocation2 + $0x20] sm:$0xff] %v163_v41  ;;  %244 = vst [vmem:[#allocation2 + $0x88] sm:$0xff] %v201_v42  ;;  %v165_v45 = vadd.f32 %v164_v43, %v405_v24  ;;  %v205_v46 = vadd.f32 %v204_v44, %v403_v23 }
  0xd2   :  { %v168_v47 = vpop.f32.mrf.mxu0  ;;  %v206_v48 = vpop.f32.mrf.mxu1 }
  0xd3   :  { %232 = vst [vmem:[#allocation2 + $0x28] sm:$0xff] %v165_v45  ;;  %245 = vst [vmem:[#allocation2 + $0x90] sm:$0xff] %v205_v46  ;;  %v169_v49 = vadd.f32 %v168_v47, %v403_v23  ;;  %v207_v50 = vadd.f32 %v206_v48, %v405_v24 }
  0xd4   :  { %v170_v51 = vpop.f32.mrf.mxu0  ;;  %v210_v52 = vpop.f32.mrf.mxu1 }
  0xd5   :  { %233 = vst [vmem:[#allocation2 + $0x30] sm:$0xff] %v169_v49  ;;  %246 = vst [vmem:[#allocation2 + $0x98] sm:$0xff] %v207_v50  ;;  %v171_v53 = vadd.f32 %v170_v51, %v405_v24  ;;  %v211_v54 = vadd.f32 %v210_v52, %v403_v23 }
  0xd6   :  { %v174_v55 = vpop.f32.mrf.mxu0  ;;  %v212_v56 = vpop.f32.mrf.mxu1 }
  0xd7   :  { %234 = vst [vmem:[#allocation2 + $0x38] sm:$0xff] %v171_v53  ;;  %247 = vst [vmem:[#allocation2 + $0xa0] sm:$0xff] %v211_v54  ;;  %v175_v57 = vadd.f32 %v174_v55, %v403_v23  ;;  %v213_v58 = vadd.f32 %v212_v56, %v405_v24 }
  0xd8   :  { %v176_v59 = vpop.f32.mrf.mxu0  ;;  %v216_v60 = vpop.f32.mrf.mxu1 }
  0xd9   :  { %235 = vst [vmem:[#allocation2 + $0x40] sm:$0xff] %v175_v57  ;;  %248 = vst [vmem:[#allocation2 + $0xa8] sm:$0xff] %v213_v58  ;;  %v177_v61 = vadd.f32 %v176_v59, %v405_v24  ;;  %v217_v62 = vadd.f32 %v216_v60, %v403_v23 }
  0xda   :  { %v180_v63 = vpop.f32.mrf.mxu0  ;;  %v218_v0 = vpop.f32.mrf.mxu1 }
  0xdb   :  { %236 = vst [vmem:[#allocation2 + $0x48] sm:$0xff] %v177_v61  ;;  %249 = vst [vmem:[#allocation2 + $0xb0] sm:$0xff] %v217_v62  ;;  %v181_v1 = vadd.f32 %v180_v63, %v403_v23  ;;  %v219_v2 = vadd.f32 %v218_v0, %v405_v24 }
  0xdc   :  { %v182_v3 = vpop.f32.mrf.mxu0  ;;  %v222_v4 = vpop.f32.mrf.mxu1 }
  0xdd   :  { %237 = vst [vmem:[#allocation2 + $0x50] sm:$0xff] %v181_v1  ;;  %250 = vst [vmem:[#allocation2 + $0xb8] sm:$0xff] %v219_v2  ;;  %v183_v5 = vadd.f32 %v182_v3, %v405_v24  ;;  %v223_v6 = vadd.f32 %v222_v4, %v403_v23 }
  0xde   :  { %v186_v7 = vpop.f32.mrf.mxu0  ;;  %v224_v8 = vpop.f32.mrf.mxu1 }
  0xdf   :  { %238 = vst [vmem:[#allocation2 + $0x58] sm:$0xff] %v183_v5  ;;  %251 = vst [vmem:[#allocation2 + $0xc0] sm:$0xff] %v223_v6  ;;  %v187_v9 = vadd.f32 %v186_v7, %v403_v23  ;;  %v225_v10 = vadd.f32 %v224_v8, %v405_v24 }
  0xe0   :  { %v188_v11 = vpop.f32.mrf.mxu0 }
  0xe1   :  { %239 = vst [vmem:[#allocation2 + $0x60] sm:$0xff] %v187_v9  ;;  %252 = vst [vmem:[#allocation2 + $0xc8] sm:$0xff] %v225_v10  ;;  %v189_v12 = vadd.f32 %v188_v11, %v405_v24 }
  0xe3   :  { %240 = vst [vmem:[#allocation2 + $0x68] sm:$0xff] %v189_v12 }
  0xe4   :  { %301 = shalt.err (!%p298_p4)
}
  0xe5   :  { %s314_s21 = smov 256   ;;  %s315_s22 = smov 16  }
  0xe6   :  { %264 = dma.vmem_to_hbm [thread:$0]  %s259_s2, 3328, %s439_s3, [#allocation3], %s314_s21, %s314_s21, %s315_s22  }
  0xe7   :  { %310 = dma.done.wait [#allocation3], 3328  }
  0xe8   :  { %311 = vsyncadd [#allocation3], 4294963968 }
  0xe9   :  { %268 = vsyncpa [#allocation3], 1 }

</bundles_post_ra>
